<compile_context>
chip_gen: v7x
topology: tpu7x:2x2x1
jax: 0.10.0
libtpu: 0.0.40
codegen_flags: <defaults>
</compile_context>

<pallas_src>
import math

import jax
import jax.numpy as jnp
from jax import lax
from jax.experimental import pallas as pl
from jax.experimental.pallas import tpu as pltpu

_MIB = 1024 * 1024
_CHUNK_ROWS = 2048          # sub-slab rows processed per in-kernel step


# ----------------------------------------------------------------------------
# Kernel
# ----------------------------------------------------------------------------
def _make_kernel(chunk_rows, n_chunks, cast_gate):
    """Kernel over one (tm, lanes) slab block; tm == chunk_rows * n_chunks."""

    def _apply(x, w, b):
        # Fused (mlp2 ∘ mlp) as one MXU matmul against the block-diag weight.
        s = jnp.dot(x, w, preferred_element_type=jnp.float32) + b
        gate = jax.nn.sigmoid(s) + 1.0          # f32, in [1, 2]
        if cast_gate:
            # bf16 residual path: avoid the f32 copy of x (perf review).
            return x * gate.astype(x.dtype)
        return x.astype(jnp.float32) * gate

    def kernel(x_ref, w_ref, b_ref, o_ref):
        w = w_ref[...]
        b = b_ref[...]
        if n_chunks == 1:
            o_ref[...] = _apply(x_ref[...], w, b).astype(o_ref.dtype)
        else:
            # Chunk the block to bound the f32 temporaries (s / gate) in VMEM.
            def body(c, carry):
                r0 = pl.multiple_of(c * chunk_rows, chunk_rows)
                xc = x_ref[pl.ds(r0, chunk_rows), :]
                o_ref[pl.ds(r0, chunk_rows), :] = _apply(xc, w, b).astype(o_ref.dtype)
                return carry

            lax.fori_loop(0, n_chunks, body, 0, unroll=True)

    return kernel


# ----------------------------------------------------------------------------
# Wrapper helpers
# ----------------------------------------------------------------------------
def _pick_group(W, max_lanes=1024):
    """g such that g*W == lcm(W, 128) (always a multiple of 128); g=1 if that
    would blow the lane/weight budget (wrapper then falls back to plain XLA)."""
    g = 128 // math.gcd(W, 128)
    if g * W > max_lanes:
        return 1
    return g


def _tpu_vmem_capacity():
    try:
        info = pltpu.get_tpu_info()
        for name in ("vmem_capacity_bytes", "vmem_size_bytes", "vmem_bytes"):
            v = getattr(info, name, None)
            if v:
                return int(v)
    except Exception:
        pass
    return 64 * _MIB      # conservative (v7x-class per-TC VMEM)


def _pick_block_rows(rows, lanes, itemsize, block_bytes):
    """Block rows from a byte budget; always multiple of 8 (or == rows); keeps
    the grid >= 2 steps whenever there are >= 16 rows (v7x megacore)."""
    cap = max(8, block_bytes // (lanes * itemsize))
    cap -= cap % (_CHUNK_ROWS if cap >= _CHUNK_ROWS else 8)
    if rows >= 2 * cap:
        return cap
    if rows >= 16:
        half = -(-rows // 2)
        if half >= _CHUNK_ROWS:
            return min(cap, (half // _CHUNK_ROWS) * _CHUNK_ROWS)
        return min(cap, ((half + 7) // 8) * 8)
    return rows


def fuse_attention_params(w1, b1, w2, b2, *, out_dtype):
    """Compose mlp2∘mlp (no nonlinearity in between) once per parameter set and
    build the lane-packed block-diagonal weight / bias.  Call this ONCE and
    reuse the result across forward calls (perf review: hoist composition)."""
    F_int, rcag = w1.shape
    assert w2.shape == (rcag, F_int) and b1.shape == (F_int,) and b2.shape == (rcag,)
    w1f, w2f = jnp.asarray(w1, jnp.float32), jnp.asarray(w2, jnp.float32)
    b1f, b2f = jnp.asarray(b1, jnp.float32), jnp.asarray(b2, jnp.float32)
    wc = w1f.T @ w2f.T                      # (rcag, rcag)
    bc = b1f @ w2f.T + b2f                  # (rcag,)

    g = _pick_group(rcag)
    lanes = g * rcag
    if g == 1:
        w_bd = wc.astype(out_dtype)
        b_bd = bc.reshape(1, rcag)
    else:
        eye = jnp.eye(g, dtype=jnp.float32)
        w_bd = jnp.einsum('ab,ij->aibj', eye, wc).reshape(lanes, lanes).astype(out_dtype)
        b_bd = jnp.tile(bc, g).reshape(1, lanes)   # stays f32 (added to f32 acc)
    return w_bd, b_bd


def attention_forward(x, w_bd, b_bd, *, block_rows=None, chunk_rows=None):
    """x: (N, C, H, W) with H == W == rcag_; (w_bd, b_bd) from fuse_attention_params."""
    N, C, H, W = x.shape
    assert H == W, "kernel implements the rcag_ == H == W case (see header note)"
    lanes = w_bd.shape[0]
    assert w_bd.shape == (lanes, lanes) and lanes % W == 0
    g = lanes // W
    dtype = x.dtype
    itemsize = jnp.dtype(dtype).itemsize
    cast_gate = jnp.dtype(dtype) == jnp.dtype(jnp.bfloat16)

    M = N * C * H
    x_flat = x.reshape(M, W)                 # free reshape (contiguous)
    rows, rem = divmod(M, g)

    def _plain(xs):
        # Same fused math as the kernel, for tiny remainders / unpackable rcag_.
        s = jnp.dot(xs, w_bd[:W, :W], preferred_element_type=jnp.float32) + b_bd[:, :W]
        gate = jax.nn.sigmoid(s) + 1.0
        return (xs.astype(jnp.float32) * gate).astype(dtype)

    if lanes % 128 != 0 or rows == 0:
        # TODO(synk): rcag_ values that cannot be packed into a 128-lane slab
        # within the VMEM budget fall back to plain XLA (no masked-store kernel).
        return _plain(x_flat).reshape(N, C, H, W)

    # Main lane-packed slab (no whole-array pad; the tiny tail is handled below).
    x_main = x_flat[: rows * g] if rem else x_flat
    x2 = x_main.reshape(rows, lanes)         # free reshape (contiguous)

    # Per-generation block / VMEM sizing.
    vmem_cap = _tpu_vmem_capacity()
    if vmem_cap >= 96 * _MIB:                # v5e / v6e class (128 MiB VMEM)
        block_bytes, vmem_limit = 8 * _MIB, 80 * _MIB
    else:                                    # v7x class (64 MiB per TC)
        block_bytes, vmem_limit = 4 * _MIB, 40 * _MIB

    if block_rows is None:
        tm = _pick_block_rows(rows, lanes, itemsize, block_bytes)
    else:
        tm = min(block_rows, rows)
        if tm < rows:
            tm = max(8, (tm // 8) * 8)       # keep the sublane dim 8-aligned when tiled

    if chunk_rows is None:
        chunk = _CHUNK_ROWS if tm > _CHUNK_ROWS else tm
    else:
        chunk = max(1, min(chunk_rows, tm))
    if tm % chunk:
        chunk = tm
    n_chunks = tm // chunk
    grid_m = pl.cdiv(rows, tm)               # ragged last block handled by Pallas

    cost = pl.CostEstimate(
        flops=2 * rows * lanes * lanes + 4 * rows * lanes,
        transcendentals=rows * lanes,
        bytes_accessed=2 * rows * lanes * itemsize + lanes * lanes * itemsize,
    )

    kernel = _make_kernel(chunk, n_chunks, cast_gate)

    out_main = pl.pallas_call(
        kernel,
        out_shape=jax.ShapeDtypeStruct((rows, lanes), dtype),
        grid_spec=pltpu.PrefetchScalarGridSpec(
            num_scalar_prefetch=0,
            grid=(grid_m,),
            in_specs=[
                pl.BlockSpec((tm, lanes), lambda i: (i, 0)),      # x slab rows, tiled
                pl.BlockSpec((lanes, lanes), lambda i: (0, 0)),   # block-diag fused weight
                pl.BlockSpec((1, lanes), lambda i: (0, 0)),       # fused bias (f32)
            ],
            out_specs=pl.BlockSpec((tm, lanes), lambda i: (i, 0)),
        ),
        compiler_params=pltpu.CompilerParams(
            dimension_semantics=("parallel",),
            vmem_limit_bytes=vmem_limit),
        cost_estimate=cost,
    )(x2, w_bd, b_bd)

    if rem == 0:
        return out_main.reshape(N, C, H, W)

    out_tail = _plain(x_flat[rows * g:])                 # < g rows of W elements
    out_flat = jnp.concatenate([out_main.reshape(rows * g, W), out_tail], axis=0)
    return out_flat.reshape(N, C, H, W)


# ----------------------------------------------------------------------------
# Reference + test harness
# ----------------------------------------------------------------------------
def reference_forward(x, w1, b1, w2, b2):
    """Pure-JAX replica of the PyTorch forward (rcag_ == H == W case), un-fused."""
    res = x
    gap = x  # AdaptiveAvgPool2d(rcag_) on an rcag_ x rcag_ input is the identity
    h = jnp.einsum('nchw,fw->nchf', gap, w1) + b1     # nn.Linear(rcag_, F_int)
    s = jnp.einsum('nchf,rf->nchr', h, w2) + b2       # nn.Linear(F_int, rcag_)
    a = jax.nn.sigmoid(s)
    return res * a + res


def init_linear(key, out_f, in_f):
    """Deterministic nn.Linear-style init: U(-1/sqrt(in), 1/sqrt(in))."""
    kw, kb = jax.random.split(key)
    bound = 1.0 / jnp.sqrt(jnp.float32(in_f))
    w = jax.random.uniform(kw, (out_f, in_f), jnp.float32, -bound, bound)
    b = jax.random.uniform(kb, (out_f,), jnp.float32, -bound, bound)
    return w, b


if __name__ == "__main__":
    key = jax.random.PRNGKey(0)

    def run_case(k, N, C, H, W, F_int, dtype, atol, rtol, **kw):
        kx, k1, k2 = jax.random.split(k, 3)
        x = jax.random.normal(kx, (N, C, H, W), jnp.float32)
        w1, b1 = init_linear(k1, F_int, W)     # self.mlp  = nn.Linear(rcag_, F_int)
        w2, b2 = init_linear(k2, W, F_int)     # self.mlp2 = nn.Linear(F_int, rcag_)
        x_in = x.astype(dtype)
        w_bd, b_bd = fuse_attention_params(w1, b1, w2, b2, out_dtype=dtype)
        if kw:
            out = attention_forward(x_in, w_bd, b_bd, **kw)
        else:
            out = jax.jit(attention_forward)(x_in, w_bd, b_bd)
        out = jax.block_until_ready(out)
        ref = reference_forward(x_in.astype(jnp.float32), w1, b1, w2, b2)
        assert out.shape == (N, C, H, W)
        err = jnp.max(jnp.abs(out.astype(jnp.float32) - ref))
        assert jnp.allclose(out.astype(jnp.float32), ref, atol=atol, rtol=rtol), (
            f"mismatch vs. reference (dtype={dtype}, shape={(N, C, H, W)}, max_err={err})")

    ks = jax.random.split(key, 5)
    # rcag_ == H == W == 16, f32 (the module's intended use); grid of 2 blocks.
    run_case(ks[0], 2, 4, 16, 16, 32, jnp.float32, 1e-4, 1e-4)
    # rcag_ == 8, N*C*H not a multiple of the packing group -> remainder path.
    run_case(ks[1], 1, 3, 8, 8, 16, jnp.float32, 1e-4, 1e-4)
    # bf16 input: native-dtype MXU operands, f32 gate math; loose tolerance.
    run_case(ks[2], 2, 4, 16, 16, 32, jnp.bfloat16, 1e-1, 1e-1)
    # Ragged last grid block (rows % tm != 0): Pallas read-pad / write-mask path.
    run_case(ks[3], 2, 13, 16, 16, 32, jnp.float32, 1e-4, 1e-4)
    # Force the in-kernel chunked fori_loop path on a tiny input.
    run_case(ks[4], 2, 4, 16, 16, 32, jnp.float32, 1e-4, 1e-4,
             block_rows=16, chunk_rows=8)

    print("KERNEL_OK")
</pallas_src>

<mosaic_0001>
module attributes {stable_mosaic.version = 11 : i64} {
  func.func @kernel(%arg0: i32, %arg1: memref<8x128xf32, #tpu.memory_space<vmem>>, %arg2: memref<128x128xf32, #tpu.memory_space<vmem>>, %arg3: memref<1x128xf32, #tpu.memory_space<vmem>>, %arg4: memref<8x128xf32, #tpu.memory_space<vmem>>) attributes {dimension_semantics = [#tpu.dimension_semantics<parallel>], iteration_bounds = array<i64: 2>, scalar_prefetch = 0 : i64, scratch_operands = 0 : i64, tpu.core_type = #tpu.core_type<tc>, window_params = [{transform_indices = @transform_0, window_bounds = array<i64: 8, 128>}, {pipeline_mode = #tpu.pipeline_mode<synchronous>, transform_indices = @transform_1, window_bounds = array<i64: 128, 128>}, {pipeline_mode = #tpu.pipeline_mode<synchronous>, transform_indices = @transform_2, window_bounds = array<i64: 1, 128>}, {transform_indices = @transform_3, window_bounds = array<i64: 8, 128>}]} {
    %c0 = arith.constant 0 : index
    %c0_0 = arith.constant 0 : index
    %0 = vector.load %arg2[%c0, %c0_0] : memref<128x128xf32, #tpu.memory_space<vmem>>, vector<128x128xf32>
    %c0_1 = arith.constant 0 : index
    %c0_2 = arith.constant 0 : index
    %1 = vector.load %arg3[%c0_1, %c0_2] : memref<1x128xf32, #tpu.memory_space<vmem>>, vector<1x128xf32>
    %c0_3 = arith.constant 0 : index
    %c0_4 = arith.constant 0 : index
    %2 = vector.load %arg1[%c0_3, %c0_4] : memref<8x128xf32, #tpu.memory_space<vmem>>, vector<8x128xf32>
    %cst = arith.constant dense<0.000000e+00> : vector<8x128xf32>
    %3 = tpu.matmul %2, %0, %cst {dimension_numbers = #tpu.dot_dimension_numbers<[1], [0], [0], [1], [0, 0, 1, 1], [], []>} : vector<8x128xf32>, vector<128x128xf32>, vector<8x128xf32> -> vector<8x128xf32>
    %4 = vector.broadcast %1 : vector<1x128xf32> to vector<8x128xf32>
    %5 = arith.addf %3, %4 : vector<8x128xf32>
    %6 = arith.negf %5 : vector<8x128xf32>
    %7 = math.exp %6 : vector<8x128xf32>
    %cst_5 = arith.constant 1.000000e+00 : f32
    %8 = vector.broadcast %cst_5 : f32 to vector<8x128xf32>
    %9 = arith.addf %8, %7 : vector<8x128xf32>
    %10 = arith.divf %8, %9 : vector<8x128xf32>
    %cst_6 = arith.constant 1.000000e+00 : f32
    %11 = vector.broadcast %cst_6 : f32 to vector<8x128xf32>
    %12 = arith.addf %10, %11 : vector<8x128xf32>
    %13 = arith.mulf %2, %12 : vector<8x128xf32>
    %c0_7 = arith.constant 0 : index
    %c0_8 = arith.constant 0 : index
    %14 = vector.load %arg4[%c0_7, %c0_8] : memref<8x128xf32, #tpu.memory_space<vmem>>, vector<8x128xf32>
    tpu.vector_store %arg4[%c0_7, %c0_8], %13 {strides = array<i32>} : memref<8x128xf32, #tpu.memory_space<vmem>>, vector<8x128xf32>,
    return
  }
  func.func @transform_0(%arg0: i32) -> (i32, i32) {
    %c0_i32 = arith.constant 0 : i32
    %c0_i32_0 = arith.constant 0 : i32
    return %arg0, %c0_i32 : i32, i32
  }
  func.func @transform_1(%arg0: i32) -> (i32, i32) {
    %c0_i32 = arith.constant 0 : i32
    %c0_i32_0 = arith.constant 0 : i32
    %c0_i32_1 = arith.constant 0 : i32
    return %c0_i32, %c0_i32_0 : i32, i32
  }
  func.func @transform_2(%arg0: i32) -> (i32, i32) {
    %c0_i32 = arith.constant 0 : i32
    %c0_i32_0 = arith.constant 0 : i32
    %c0_i32_1 = arith.constant 0 : i32
    return %c0_i32, %c0_i32_0 : i32, i32
  }
  func.func @transform_3(%arg0: i32) -> (i32, i32) {
    %c0_i32 = arith.constant 0 : i32
    %c0_i32_0 = arith.constant 0 : i32
    return %arg0, %c0_i32 : i32, i32
  }
}

</mosaic_0001>

<bundles_post_ra>
// kernel: attention_forward.1
= control target key start
LH: loop header
LB: loop body
LE: loop exit
PB: predicated region body
PF: predicated region fallthrough
CT: control target
= control target key end

     0   :  { %s455_s12 = smov 0   ;;  %s527_s0 = inlined_call_operand.vmem [shape: f32[16,128], index: 0, kind: input, shape index: {}]   ;;  %s528_s1 = inlined_call_operand.vmem [shape: f32[128,128], index: 1, kind: input, shape index: {}]   ;;  %s529_s2 = inlined_call_operand.vmem [shape: f32[1,128], index: 2, kind: input, shape index: {}]   ;;  %s530_s3 = inlined_call_operand.vmem [shape: f32[16,128], index: 3, kind: output, shape index: {}]  }
   0x1 LB: > { %s322_s13 = sadd.s32 4294967295, %s430_s12   ;;  %p326_p0 = scmp.ge.s32.totalorder %s430_s12, 1  ;;  %s430_s12 = sphi %s455_s12, %s13_s12  }
   0x2   : > { %p136_p1 = scmp.lt.s32.totalorder %s430_s12, 3 }
   0x4   : > { %p137_p2 = pnand %p326_p0, %p136_p1 }
   0x5   : > { %v166_v0 = vld [vmem:[%s528_s1] sm:$0xff] (!%p137_p2)  ;;  %v167_v1 = vld [vmem:[%s528_s1 + $0x8] sm:$0xff] (!%p137_p2)  ;;  %v168_v2 = vld [vmem:[%s528_s1 + $0x10] sm:$0xff] (!%p137_p2)  ;;  %v432_v3 = vmov (!%p137_p2), 0.0|0.0   ;;  %vm433_vm0 = vmmov (!%p137_p2), 0   ;;  %v434_v6 = vmov (!%p137_p2), 0.0  }
   0x6   : > { %140 = sbr.rel (%p137_p2) target bundleno = 284 (0x11c), region = 32  ;;  %385 = vmatprep.subr.bf16.mxu0 (!%p137_p2), %v432_v3  ;;  %v386_v4 = vpack.c.bf16 (!%p137_p2), %v167_v1, %v166_v0  ;;  %v169_v5 = vld [vmem:[%s528_s1 + $0x18] sm:$0xff] (!%p137_p2)  ;;  %382 = vmatprep.mubr.msk.f32.mxu0 (!%p137_p2), %vm433_vm0, %v434_v6  ;;  %v170_v8 = vld [vmem:[%s528_s1 + $0x20] sm:$0xff] (!%p137_p2)  ;;  %v171_v9 = vld [vmem:[%s528_s1 + $0x28] sm:$0xff] (!%p137_p2)  ;;  %p158_p3 = scmp.lt.s32.totalorder (!%p137_p2), %s322_s13, 1 }
   0x7   : > { %v389_v7 = vpack.c.bf16 (!%p137_p2), %v169_v5, %v168_v2  ;;  %v392_v10 = vpack.c.bf16 (!%p137_p2), %v171_v9, %v170_v8  ;;  %v172_v11 = vld [vmem:[%s528_s1 + $0x30] sm:$0xff] (!%p137_p2)  ;;  %v173_v12 = vld [vmem:[%s528_s1 + $0x38] sm:$0xff] (!%p137_p2)  ;;  %v174_v14 = vld [vmem:[%s528_s1 + $0x40] sm:$0xff] (!%p137_p2) }
   0x8   : > { %387 = vmatpush3.bf16.msra.mxu0 (!%p137_p2), %v386_v4  ;;  %v395_v13 = vpack.c.bf16 (!%p137_p2), %v173_v12, %v172_v11  ;;  %v175_v15 = vld [vmem:[%s528_s1 + $0x48] sm:$0xff] (!%p137_p2)  ;;  %v176_v17 = vld [vmem:[%s528_s1 + $0x50] sm:$0xff] (!%p137_p2)  ;;  %v177_v18 = vld [vmem:[%s528_s1 + $0x58] sm:$0xff] (!%p137_p2) }
   0x9   : > { %388 = vmatprep.subr.bf16.mxu0 (!%p137_p2), %v432_v3  ;;  %v398_v16 = vpack.c.bf16 (!%p137_p2), %v175_v15, %v174_v14  ;;  %v401_v19 = vpack.c.bf16 (!%p137_p2), %v177_v18, %v176_v17  ;;  %v178_v20 = vld [vmem:[%s528_s1 + $0x60] sm:$0xff] (!%p137_p2)  ;;  %v179_v21 = vld [vmem:[%s528_s1 + $0x68] sm:$0xff] (!%p137_p2)  ;;  %v180_v23 = vld [vmem:[%s528_s1 + $0x70] sm:$0xff] (!%p137_p2) }
   0xa   : > { %v404_v22 = vpack.c.bf16 (!%p137_p2), %v179_v21, %v178_v20  ;;  %v181_v24 = vld [vmem:[%s528_s1 + $0x78] sm:$0xff] (!%p137_p2)  ;;  %v329_v27 = vld [vmem:[%s529_s2] ss:$0 sm:$0xff] (!%p137_p2) }
   0xb   : > { %v407_v25 = vpack.c.bf16 (!%p137_p2), %v181_v24, %v180_v23 }
   0xc   : > { %390 = vmatpush3.bf16.msra.mxu0 (!%p137_p2), %v389_v7 }
   0xd   : > { %391 = vmatprep.subr.bf16.mxu0 %v432_v3  ;;  %s532_s13 = smov (!%p158_p3, %s322_s13), 1 }
   0xe   : > { %s327_s21 = sshll.u32 %s532_s13, 3 }
   0xf   : > { %s161_s24 = scalar_lea.vmem %s527_s0, %s327_s21  ;;  %s165_s28 = scalar_lea.vmem %s530_s3, %s327_s21 }
  0x10   : > { %393 = vmatpush3.bf16.msra.mxu0 %v392_v10  ;;  %v183_v26 = vld [vmem:[%s161_s24] sm:$0xff] }
  0x11   : > { %394 = vmatprep.subr.bf16.mxu0 %v432_v3 }
  0x14   : > { %396 = vmatpush3.bf16.msra.mxu0 %v395_v13 }
  0x15   : > { %397 = vmatprep.subr.bf16.mxu0 %v432_v3 }
  0x18   : > { %399 = vmatpush3.bf16.msra.mxu0 %v398_v16 }
  0x19   : > { %400 = vmatprep.subr.bf16.mxu0 %v432_v3 }
  0x1c   : > { %402 = vmatpush3.bf16.msra.mxu0 %v401_v19 }
  0x1d   : > { %403 = vmatprep.subr.bf16.mxu0 %v432_v3 }
  0x20   : > { %405 = vmatpush3.bf16.msra.mxu0 %v404_v22 }
  0x21   : > { %406 = vmatprep.subr.bf16.mxu0 %v432_v3 }
  0x24   : > { %408 = vmatpush3.bf16.msra.mxu0 %v407_v25 }
  0x27   : > { %383 = vmatmul.mubr.f32.vlgmr.msra.gmra.mrb[0].mxu0 %v183_v26 }
  0xfa   : > { %v256_v28 = vpop.f32.mrb[0].mxu0 }
  0xfb   : > { %v257_v29 = vadd.f32 %v329_v27, %v256_v28  ;;  %v384_v30 = vpop.f32.mrb[1].mxu0 }
  0xfd   : > { %v330_v31 = vmul.f32 -1.442695, %v257_v29 }
  0xff   : > { %420 = vpow2.f32 %v330_v31 }
 0x109   : > { %v421_v32 = vpop.eup %420 }
 0x10a   : > { %v263_v33 = vadd.f32 1.0, %v421_v32 }
 0x10c   : > { %422 = vrcp.f32 %v263_v33 }
 0x116   : > { %v423_v34 = vpop.eup %422 }
 0x117   : > { %v266_v35 = vadd.f32 1.0, %v423_v34 }
 0x119   : > { %v267_v36 = vmul.f32 %v266_v35, %v183_v26 }
 0x11b   : > { %268 = vst [vmem:[%s165_s28] sm:$0xff] %v267_v36 }
 0x11c PF: > { %s13_s12 = sadd.s32 1, %s430_s12  }
 0x11d   : > { %p10_p4 = scmp.ge.s32.totalorder %s13_s12, 4  }
 0x11f   :  { %12 = sbr.rel (!%p10_p4) target bundleno = 1 (0x1), region = 62 }

</bundles_post_ra>
